<compile_context>
chip_gen: v7x
topology: tpu7x:2x2x1
jax: 0.10.0
libtpu: 0.0.40
codegen_flags: <defaults>
</compile_context>

<pallas_src>
import functools

import jax
import jax.numpy as jnp
from jax import lax
from jax.experimental import pallas as pl
from jax.experimental.pallas import tpu as pltpu

_EPS = 1e-8          # F.cosine_similarity default eps
_LANE = 128
_ABS_TILE_CAP = 32768  # bounds the unrolled lane-chunk add tree (<= 256 chunks/input)


def _channel_sum_kernel(t_ref, s_ref, t_out_ref, s_out_ref, *,
                        hw, tile_hw, n_tiles, tiles_per_split):
    # t_ref: (1, Cin,  TILE_HW) teacher tile (native dtype)
    # s_ref: (1, Cout, TILE_HW) student tile (native dtype)
    # t_out_ref: (1, 1, Cin, 128)  per-(sample, split) lane-partial channel sums (f32)
    # s_out_ref: (1, 1, Cout, 128) per-(sample, split) lane-partial channel sums (f32)
    sp = pl.program_id(1)
    h = pl.program_id(2)
    g = sp * tiles_per_split + h          # global spatial-tile index

    @pl.when(h == 0)
    def _init():
        t_out_ref[...] = jnp.zeros_like(t_out_ref)
        s_out_ref[...] = jnp.zeros_like(s_out_ref)

    n_chunks = tile_hw // _LANE

    def lane_partial(tile):
        # (C, tile_hw) f32 -> (C, 128) lane-partial sums via vreg-aligned static
        # slices + a pairwise add tree (pure VALU; hides under the streaming DMA).
        chunks = [tile[:, j * _LANE:(j + 1) * _LANE] for j in range(n_chunks)]
        while len(chunks) > 1:
            nxt = [a + b for a, b in zip(chunks[0::2], chunks[1::2])]
            if len(chunks) % 2:
                nxt.append(chunks[-1])
            chunks = nxt
        return chunks[0]

    def accumulate(masked):
        t_tile = t_ref[0].astype(jnp.float32)     # (Cin, tile_hw)
        s_tile = s_ref[0].astype(jnp.float32)     # (Cout, tile_hw)
        if masked:
            # Mask out-of-range spatial columns; only ever traced/run for the single
            # ragged last tile.
            col = lax.broadcasted_iota(jnp.int32, (1, tile_hw), 1)
            valid = col < (hw - g * tile_hw)
            t_tile = jnp.where(valid, t_tile, 0.0)
            s_tile = jnp.where(valid, s_tile, 0.0)
        t_out_ref[0, 0] = t_out_ref[0, 0] + lane_partial(t_tile)
        s_out_ref[0, 0] = s_out_ref[0, 0] + lane_partial(s_tile)

    if hw % tile_hw == 0:
        accumulate(masked=False)                  # no ragged tile at all (trace-time)
    else:
        @pl.when(g < n_tiles - 1)
        def _hot():
            accumulate(masked=False)

        @pl.when(g == n_tiles - 1)
        def _last():
            accumulate(masked=True)


def _device_vmem_bytes():
    try:
        return int(pltpu.get_tpu_info().vmem_capacity_bytes)
    except Exception:
        return 64 * 1024 * 1024   # conservative fallback: v7x per-TensorCore physical


def _pick_tile_hw(hw, cin, cout, t_bytes, s_bytes):
    """VMEM/channel/dtype-aware lane-dense spatial tile."""
    hw_cols = int(pl.cdiv(hw, _LANE)) * _LANE
    # Double-buffered teacher+student bytes per spatial column.
    bytes_per_col = 2 * (cin * t_bytes + cout * s_bytes)
    stream_budget = _device_vmem_bytes() // 2     # leave half of VMEM as headroom
    budget_cols = (stream_budget // max(bytes_per_col, 1)) // _LANE * _LANE
    budget_cols = max(budget_cols, _LANE)
    return int(max(min(hw_cols, budget_cols, _ABS_TILE_CAP), _LANE))


def cosine_similarity_loss(teacher_features, student_features, conv_weight, conv_bias,
                           *, tile_hw=None):
    """teacher_features: (B, Cin, H, W), student_features: (B, Cout, H, W),
    conv_weight: (Cout, Cin, 1, 1), conv_bias: (Cout,).  Returns scalar f32 loss."""
    B, Cin, H, W = teacher_features.shape
    Bs, Cout, Hs, Ws = student_features.shape
    hw = H * W
    assert B == Bs and hw == Hs * Ws, "teacher/student must share batch and spatial size"

    t_bytes = teacher_features.dtype.itemsize
    s_bytes = student_features.dtype.itemsize

    if tile_hw is None:
        tile_hw = _pick_tile_hw(hw, Cin, Cout, t_bytes, s_bytes)
    assert tile_hw > 0 and tile_hw % _LANE == 0, "tile_hw must be a multiple of 128"

    n_tiles = int(pl.cdiv(hw, tile_hw))
    # Megacore coverage when B == 1 (v7x has 2 TensorCores): split the spatial axis
    # into two parallel super-chunks so both cores stream HBM concurrently.
    n_split = 2 if (B == 1 and n_tiles >= 2 and n_tiles % 2 == 0) else 1
    tiles_per_split = n_tiles // n_split

    # Keep native dtype (no wrapper f32 casts -> no extra HBM copy).
    t = teacher_features.reshape(B, Cin, hw)
    s = student_features.reshape(B, Cout, hw)

    kernel = functools.partial(_channel_sum_kernel, hw=hw, tile_hw=tile_hw,
                               n_tiles=n_tiles, tiles_per_split=tiles_per_split)

    # VMEM ask: double-buffered input tiles + (tiny) resident outputs + headroom.
    vmem_need = 2 * tile_hw * (Cin * t_bytes + Cout * s_bytes) \
        + 2 * (Cin + Cout) * _LANE * 4
    vmem_limit = int(min(_device_vmem_bytes(), max(vmem_need + (8 << 20), 16 << 20)))

    bytes_accessed = B * hw * (Cin * t_bytes + Cout * s_bytes) \
        + B * n_split * (Cin + Cout) * _LANE * 4
    cost = pl.CostEstimate(flops=2 * B * hw * (Cin + Cout),
                           transcendentals=0,
                           bytes_accessed=bytes_accessed)

    t_sums, s_sums = pl.pallas_call(
        kernel,
        out_shape=(jax.ShapeDtypeStruct((B, n_split, Cin, _LANE), jnp.float32),
                   jax.ShapeDtypeStruct((B, n_split, Cout, _LANE), jnp.float32)),
        grid_spec=pltpu.PrefetchScalarGridSpec(
            num_scalar_prefetch=0,
            grid=(B, n_split, tiles_per_split),
            in_specs=[
                pl.BlockSpec((1, Cin, tile_hw),
                             lambda b, sp, h: (b, 0, sp * tiles_per_split + h)),
                pl.BlockSpec((1, Cout, tile_hw),
                             lambda b, sp, h: (b, 0, sp * tiles_per_split + h)),
            ],
            out_specs=[
                pl.BlockSpec((1, 1, Cin, _LANE), lambda b, sp, h: (b, sp, 0, 0)),
                pl.BlockSpec((1, 1, Cout, _LANE), lambda b, sp, h: (b, sp, 0, 0)),
            ],
        ),
        compiler_params=pltpu.CompilerParams(
            dimension_semantics=("parallel", "parallel", "arbitrary"),
            vmem_limit_bytes=vmem_limit,
        ),
        cost_estimate=cost,
    )(t, s)

    # Tiny per-sample epilogue in plain JAX: fold splits + lanes, means, 1x1-conv
    # hoist (W @ mean_HW(T) + bias), cosine similarity, 1 - mean.
    inv_hw = jnp.float32(1.0 / hw)
    t_mean = t_sums.sum(axis=(1, 3)) * inv_hw             # (B, Cin)
    s_mean = s_sums.sum(axis=(1, 3)) * inv_hw             # (B, Cout)
    w = conv_weight.reshape(Cout, Cin).astype(jnp.float32)
    bias = conv_bias.reshape(Cout).astype(jnp.float32)
    proj = t_mean @ w.T + bias                            # (B, Cout)
    dot = jnp.sum(proj * s_mean, axis=-1)
    tn = jnp.maximum(jnp.sqrt(jnp.sum(proj * proj, axis=-1)), _EPS)
    sn = jnp.maximum(jnp.sqrt(jnp.sum(s_mean * s_mean, axis=-1)), _EPS)
    cos = dot / (tn * sn)
    return jnp.float32(1.0) - jnp.mean(cos)


def _reference_loss(teacher, student, weight, bias):
    """Plain-JAX reference mirroring the PyTorch module, for verification."""
    B, Cin, H, W = teacher.shape
    Cout = weight.shape[0]
    t = teacher.astype(jnp.float32)
    s = student.astype(jnp.float32)
    w = weight.reshape(Cout, Cin).astype(jnp.float32)
    proj = jnp.einsum("oc,bchw->bohw", w, t) + bias.astype(jnp.float32)[None, :, None, None]
    t_vec = proj.reshape(B, Cout, -1).mean(-1)
    s_vec = s.reshape(B, s.shape[1], -1).mean(-1)
    eps = 1e-8
    dot = jnp.sum(t_vec * s_vec, axis=1)
    tn = jnp.maximum(jnp.linalg.norm(t_vec, axis=1), eps)
    sn = jnp.maximum(jnp.linalg.norm(s_vec, axis=1), eps)
    return 1.0 - jnp.mean(dot / (tn * sn))


if __name__ == "__main__":
    key = jax.random.PRNGKey(0)

    def make_inputs(B, Cin, Cout, H, W, dtype):
        k_t, k_s, k_b = jax.random.split(jax.random.fold_in(key, H * W + Cin + B), 3)
        teacher = jax.random.normal(k_t, (B, Cin, H, W), dtype=jnp.float32).astype(dtype)
        student = jax.random.normal(k_s, (B, Cout, H, W), dtype=jnp.float32).astype(dtype)
        # FixedChannelReducer: weight filled with 1/in_channels; bias stands in for
        # PyTorch's default Conv2d bias init U(-1/sqrt(fan_in), 1/sqrt(fan_in)).
        conv_weight = jnp.full((Cout, Cin, 1, 1), 1.0 / Cin, dtype=jnp.float32)
        bound = 1.0 / (Cin ** 0.5)
        conv_bias = jax.random.uniform(k_b, (Cout,), minval=-bound, maxval=bound,
                                       dtype=jnp.float32)
        return teacher, student, conv_weight, conv_bias

    # Case 1: f32 inputs, spatial size an exact multiple of the 128-lane tile.
    args1 = make_inputs(2, 16, 8, 16, 16, jnp.float32)
    loss1 = jax.block_until_ready(cosine_similarity_loss(*args1))
    ref1 = jax.block_until_ready(_reference_loss(*args1))
    assert jnp.allclose(loss1, ref1, atol=1e-5, rtol=1e-4), (loss1, ref1)

    # Case 2: bf16 inputs with a ragged spatial size (native-dtype streaming + the
    # pl.when-gated masked last tile).
    args2 = make_inputs(2, 16, 8, 15, 15, jnp.bfloat16)
    loss2 = jax.block_until_ready(cosine_similarity_loss(*args2))
    ref2 = jax.block_until_ready(_reference_loss(*args2))
    assert jnp.allclose(loss2, ref2, atol=1e-4, rtol=1e-3), (loss2, ref2)

    # Case 3: B == 1 with a forced small tile -> exercises the parallel HW super-split.
    args3 = make_inputs(1, 16, 8, 16, 16, jnp.float32)
    loss3 = jax.block_until_ready(cosine_similarity_loss(*args3, tile_hw=128))
    ref3 = jax.block_until_ready(_reference_loss(*args3))
    assert jnp.allclose(loss3, ref3, atol=1e-5, rtol=1e-4), (loss3, ref3)

    # Case 4: B == 1, ragged spatial size AND the HW super-split together.
    args4 = make_inputs(1, 16, 8, 20, 20, jnp.float32)
    loss4 = jax.block_until_ready(cosine_similarity_loss(*args4, tile_hw=128))
    ref4 = jax.block_until_ready(_reference_loss(*args4))
    assert jnp.allclose(loss4, ref4, atol=1e-5, rtol=1e-4), (loss4, ref4)

    print("KERNEL_OK")
</pallas_src>

<mosaic_0001>
module attributes {stable_mosaic.version = 11 : i64} {
  func.func @_channel_sum_kernel(%arg0: i32, %arg1: i32, %arg2: i32, %arg3: memref<1x16x256xf32, #tpu.memory_space<vmem>>, %arg4: memref<1x8x256xf32, #tpu.memory_space<vmem>>, %arg5: memref<1x1x16x128xf32, #tpu.memory_space<vmem>>, %arg6: memref<1x1x8x128xf32, #tpu.memory_space<vmem>>) attributes {dimension_semantics = [#tpu.dimension_semantics<parallel>, #tpu.dimension_semantics<parallel>, #tpu.dimension_semantics<arbitrary>], iteration_bounds = array<i64: 2, 1, 1>, scalar_prefetch = 0 : i64, scratch_operands = 0 : i64, tpu.core_type = #tpu.core_type<tc>, window_params = [{transform_indices = @transform_0, window_bounds = array<i64: 1, 16, 256>}, {transform_indices = @transform_1, window_bounds = array<i64: 1, 8, 256>}, {transform_indices = @transform_2, window_bounds = array<i64: 1, 1, 16, 128>}, {transform_indices = @transform_3, window_bounds = array<i64: 1, 1, 8, 128>}]} {
    %c0_i32 = arith.constant 0 : i32
    %0 = arith.cmpi eq, %arg2, %c0_i32 : i32
    %1 = arith.extui %0 : i1 to i32
    %c0_i32_0 = arith.constant 0 : i32
    %2 = arith.cmpi ne, %1, %c0_i32_0 : i32
    scf.if %2 {
      %cst = arith.constant 0.000000e+00 : f32
      %25 = vector.broadcast %cst : f32 to vector<1x1x16x128xf32>
      %c0_22 = arith.constant 0 : index
      %c0_23 = arith.constant 0 : index
      %c0_24 = arith.constant 0 : index
      %c0_25 = arith.constant 0 : index
      %26 = vector.load %arg5[%c0_22, %c0_23, %c0_24, %c0_25] : memref<1x1x16x128xf32, #tpu.memory_space<vmem>>, vector<1x1x16x128xf32>
      tpu.vector_store %arg5[%c0_22, %c0_23, %c0_24, %c0_25], %25 {strides = array<i32>} : memref<1x1x16x128xf32, #tpu.memory_space<vmem>>, vector<1x1x16x128xf32>,
      %cst_26 = arith.constant 0.000000e+00 : f32
      %27 = vector.broadcast %cst_26 : f32 to vector<1x1x8x128xf32>
      %c0_27 = arith.constant 0 : index
      %c0_28 = arith.constant 0 : index
      %c0_29 = arith.constant 0 : index
      %c0_30 = arith.constant 0 : index
      %28 = vector.load %arg6[%c0_27, %c0_28, %c0_29, %c0_30] : memref<1x1x8x128xf32, #tpu.memory_space<vmem>>, vector<1x1x8x128xf32>
      tpu.vector_store %arg6[%c0_27, %c0_28, %c0_29, %c0_30], %27 {strides = array<i32>} : memref<1x1x8x128xf32, #tpu.memory_space<vmem>>, vector<1x1x8x128xf32>,
    } else {
    }
    %c0 = arith.constant 0 : index
    %c0_1 = arith.constant 0 : index
    %c0_2 = arith.constant 0 : index
    %3 = vector.load %arg3[%c0, %c0_1, %c0_2] : memref<1x16x256xf32, #tpu.memory_space<vmem>>, vector<1x16x256xf32>
    %4 = vector.shape_cast %3 : vector<1x16x256xf32> to vector<16x256xf32>
    %c0_3 = arith.constant 0 : index
    %c0_4 = arith.constant 0 : index
    %c0_5 = arith.constant 0 : index
    %5 = vector.load %arg4[%c0_3, %c0_4, %c0_5] : memref<1x8x256xf32, #tpu.memory_space<vmem>>, vector<1x8x256xf32>
    %6 = vector.shape_cast %5 : vector<1x8x256xf32> to vector<8x256xf32>
    %c0_6 = arith.constant 0 : index
    %c0_7 = arith.constant 0 : index
    %c0_8 = arith.constant 0 : index
    %c0_9 = arith.constant 0 : index
    %7 = vector.load %arg5[%c0_6, %c0_7, %c0_8, %c0_9] : memref<1x1x16x128xf32, #tpu.memory_space<vmem>>, vector<1x1x16x128xf32>
    %8 = vector.shape_cast %7 : vector<1x1x16x128xf32> to vector<16x128xf32>
    %9 = vector.extract_strided_slice %4 {offsets = [0, 0], sizes = [16, 128], strides = [1, 1]} : vector<16x256xf32> to vector<16x128xf32>
    %10 = vector.extract_strided_slice %4 {offsets = [0, 128], sizes = [16, 128], strides = [1, 1]} : vector<16x256xf32> to vector<16x128xf32>
    %11 = arith.addf %9, %10 : vector<16x128xf32>
    %12 = arith.addf %8, %11 : vector<16x128xf32>
    %c0_10 = arith.constant 0 : index
    %c0_11 = arith.constant 0 : index
    %c0_12 = arith.constant 0 : index
    %c0_13 = arith.constant 0 : index
    %13 = vector.load %arg5[%c0_10, %c0_11, %c0_12, %c0_13] : memref<1x1x16x128xf32, #tpu.memory_space<vmem>>, vector<1x1x16x128xf32>
    %14 = vector.shape_cast %13 : vector<1x1x16x128xf32> to vector<16x128xf32>
    %15 = vector.shape_cast %12 : vector<16x128xf32> to vector<1x1x16x128xf32>
    tpu.vector_store %arg5[%c0_10, %c0_11, %c0_12, %c0_13], %15 {strides = array<i32>} : memref<1x1x16x128xf32, #tpu.memory_space<vmem>>, vector<1x1x16x128xf32>,
    %c0_14 = arith.constant 0 : index
    %c0_15 = arith.constant 0 : index
    %c0_16 = arith.constant 0 : index
    %c0_17 = arith.constant 0 : index
    %16 = vector.load %arg6[%c0_14, %c0_15, %c0_16, %c0_17] : memref<1x1x8x128xf32, #tpu.memory_space<vmem>>, vector<1x1x8x128xf32>
    %17 = vector.shape_cast %16 : vector<1x1x8x128xf32> to vector<8x128xf32>
    %18 = vector.extract_strided_slice %6 {offsets = [0, 0], sizes = [8, 128], strides = [1, 1]} : vector<8x256xf32> to vector<8x128xf32>
    %19 = vector.extract_strided_slice %6 {offsets = [0, 128], sizes = [8, 128], strides = [1, 1]} : vector<8x256xf32> to vector<8x128xf32>
    %20 = arith.addf %18, %19 : vector<8x128xf32>
    %21 = arith.addf %17, %20 : vector<8x128xf32>
    %c0_18 = arith.constant 0 : index
    %c0_19 = arith.constant 0 : index
    %c0_20 = arith.constant 0 : index
    %c0_21 = arith.constant 0 : index
    %22 = vector.load %arg6[%c0_18, %c0_19, %c0_20, %c0_21] : memref<1x1x8x128xf32, #tpu.memory_space<vmem>>, vector<1x1x8x128xf32>
    %23 = vector.shape_cast %22 : vector<1x1x8x128xf32> to vector<8x128xf32>
    %24 = vector.shape_cast %21 : vector<8x128xf32> to vector<1x1x8x128xf32>
    tpu.vector_store %arg6[%c0_18, %c0_19, %c0_20, %c0_21], %24 {strides = array<i32>} : memref<1x1x8x128xf32, #tpu.memory_space<vmem>>, vector<1x1x8x128xf32>,
    return
  }
  func.func @transform_0(%arg0: i32, %arg1: i32, %arg2: i32) -> (i32, i32, i32) {
    %c1_i32 = arith.constant 1 : i32
    %0 = arith.muli %arg1, %c1_i32 : i32
    %1 = arith.addi %0, %arg2 : i32
    %c0_i32 = arith.constant 0 : i32
    %c0_i32_0 = arith.constant 0 : i32
    return %arg0, %c0_i32, %1 : i32, i32, i32
  }
  func.func @transform_1(%arg0: i32, %arg1: i32, %arg2: i32) -> (i32, i32, i32) {
    %c1_i32 = arith.constant 1 : i32
    %0 = arith.muli %arg1, %c1_i32 : i32
    %1 = arith.addi %0, %arg2 : i32
    %c0_i32 = arith.constant 0 : i32
    %c0_i32_0 = arith.constant 0 : i32
    return %arg0, %c0_i32, %1 : i32, i32, i32
  }
  func.func @transform_2(%arg0: i32, %arg1: i32, %arg2: i32) -> (i32, i32, i32, i32) {
    %c0_i32 = arith.constant 0 : i32
    %c0_i32_0 = arith.constant 0 : i32
    %c0_i32_1 = arith.constant 0 : i32
    return %arg0, %arg1, %c0_i32, %c0_i32_0 : i32, i32, i32, i32
  }
  func.func @transform_3(%arg0: i32, %arg1: i32, %arg2: i32) -> (i32, i32, i32, i32) {
    %c0_i32 = arith.constant 0 : i32
    %c0_i32_0 = arith.constant 0 : i32
    %c0_i32_1 = arith.constant 0 : i32
    return %arg0, %arg1, %c0_i32, %c0_i32_0 : i32, i32, i32, i32
  }
}

</mosaic_0001>

<bundles_post_ra>
// kernel: tpu_custom_call.1
= control target key start
LH: loop header
LB: loop body
LE: loop exit
PB: predicated region body
PF: predicated region fallthrough
CT: control target
= control target key end

     0   :  { %9 = vsyncpa [#allocation3], 0  ;;  %s1048_s0 = inlined_call_operand.hbm [shape: f32[2,16,256], index: 0, kind: input, shape index: {}]   ;;  %s1049_s1 = inlined_call_operand.hbm [shape: f32[2,8,256], index: 1, kind: input, shape index: {}]   ;;  %s1050_s2 = inlined_call_operand.hbm [shape: f32[2,1,16,128], index: 2, kind: output, shape index: {0}]   ;;  %s1051_s3 = inlined_call_operand.hbm [shape: f32[2,1,8,128], index: 3, kind: output, shape index: {1}]  }
   0x1   :  { %11 = vsyncpa [#allocation3 + $0x1], 0 }
   0x2   :  { %12 = vsyncpa [#allocation6], 0 }
   0x3   :  { %14 = vsyncpa [#allocation6 + $0x1], 0 }
   0x4   :  { %15 = vsyncpa [#allocation4], 0 }
   0x5   :  { %17 = vsyncpa [#allocation4 + $0x1], 0 }
   0x6   :  { %18 = vsyncpa [#allocation9], 0 }
   0x7   :  { %20 = vsyncpa [#allocation9 + $0x1], 0  ;;  %s800_s12 = smov 0   ;;  %s802_s13 = smov 0  }
   0x8   :  { %s804_s14 = smov 0   ;;  %s806_s15 = smov 0  }
   0x9   :  { %s808_s16 = smov 0   ;;  %s810_s17 = smov 0  }
   0xa LB: > { %s490_s18 = sadd.s32 4294967295, %s770_s17   ;;  %s491_s19 = sadd.s32 4294967294, %s770_s17   ;;  %s770_s17 = sphi %s810_s17, %s26_s17   ;;  %s766_s16 = sphi %s808_s16, %s1070_s16   ;;  %s762_s15 = sphi %s806_s15, %s1069_s15   ;;  %s758_s14 = sphi %s804_s14, %s1068_s14   ;;  %s754_s13 = sphi %s802_s13, %s1067_s13   ;;  %s750_s12 = sphi %s800_s12, %s1066_s12  }
   0xb   : > { %s45_s20 = sadd.s32 1, %s766_s16  ;;  %s56_s21 = sadd.s32 1, %s758_s14 }
   0xc   : > { %p47_p0 = scmp.ge.s32.totalorder %s45_s20, 2  ;;  %p63_p1 = scmp.ne.s32.totalorder %s758_s14, %s754_s13 }
   0xd   : > { %p64_p2 = scmp.eq.s32.totalorder %s770_s17, 0  ;;  %p69_p3 = scmp.ne.s32.totalorder %s754_s13, %s750_s12 }
   0xe   : > { %s1072_s20 = smov (%p47_p0, %s45_s20), 0  ;;  %p70_p5 = scmp.eq.s32.totalorder %s490_s18, 0 }
   0xf   : > { %p841_p4 = por %p64_p2, %p63_p1  ;;  %s51_s23 = ssub.s32 %s766_s16, %s1072_s20 }
  0x10   : > { %p125_p6 = scmp.eq.s32.totalorder %s490_s18, 1  ;;  %p54_p7 = scmp.eq.s32.totalorder %s51_s23, 0 }
  0x11   : > { %p847_p8 = por %p70_p5, %p69_p3  ;;  %p131_p10 = scmp.eq.s32.totalorder %s491_s19, 1 }
  0x12   : > { %p851_p9 = por %p125_p6, %p63_p1  ;;  %p537_p13 = scmp.lt.s32.totalorder %s770_s17, 2 }
  0x13   : > { %s1055_s24 = scalar_select %p847_p8, 1, 0 }
  0x14   : > { %s1056_s25 = scalar_select %p851_p9, 1, 0 }
  0x15   : > { %s856_s26 = scalar_select %p54_p7, %s758_s14, %s56_s21  }
  0x16   : > { %p858_p11 = por %p131_p10, %p69_p3  ;;  %s865_s28 = sand.u32 1, %s758_s14  }
  0x17   : > { %s494_s29 = sshll.u32 %s865_s28, 5  ;;  %s512_s30 = sshll.u32 %s766_s16, 9 }
  0x18   : > { %s1057_s27 = scalar_select %p858_p11, 1, 0 }
  0x19   : > { %s872_s6 = scalar_lea.hbm %s1048_s0, %s512_s30  ;;  %s183_s7 = scalar_lea.vmem [#allocation2], %s494_s29 }
  0x1a   : > { %s193_s8 = sshll.u32 %s183_s7, 4  ;;  %p878_p0 = pnand %p537_p13, %p841_p4  ;;  %s874_s8 = int_to_ptr.vmem [resolvable:$true] %s193_s8 }
  0x1b   : > { %s180_s10 = scalar_lea.sflag [#allocation3], %s865_s28  ;;  %s592_s11 = scalar_lea.hbm %s872_s6, 512 }
  0x1c   : > { %p593_p2 = scmp.ne.s32.totalorder %s872_s6, %s592_s11  ;;  %p594_p3 = pneg %p878_p0 }
  0x1d   : > { %s597_s21 = scalar_lea.hbm %s1048_s0, 1024  ;;  %p598_p4 = scmp.lt.u32.totalorder %s872_s6, %s1048_s0 }
  0x1e   : > { %p595_p5 = pnand %p594_p3, %p593_p2  ;;  %p599_p7 = scmp.lt.u32.totalorder %s597_s21, %s592_s11 }
  0x1f   : > { %p601_p13 = scmp.lt.u32.totalorder %s592_s11, %s872_s6 }
  0x20   : > { %p596_p6 = pneg %p595_p5  ;;  %p600_p10 = por %p599_p7, %p598_p4 }
  0x22   : > { %p602_p12 = por %p601_p13, %p600_p10 }
  0x24   : > { %p603_p1 = pnand %p602_p12, %p596_p6 }
  0x26   : > { %606 = shalt.err (!%p603_p1)
}
  0x27   : > { %s607_s29 = scalar_lea.vmem %s874_s8, 512  ;;  %s772_s30 = smov [#allocation2]  }
  0x28   : > { %p608_p2 = scmp.ne.s32.totalorder %s874_s8, %s607_s29  ;;  %s612_s4 = sshll.u32 %s772_s30, 4  ;;  %s613_s4 = int_to_ptr.vmem [resolvable:$false] %s612_s4 }
  0x29   : > { %s614_s5 = scalar_lea.vmem %s613_s4, 1024  ;;  %p615_p9 = scmp.lt.s32.totalorder %s874_s8, %s613_s4 }
  0x2a   : > { %p610_p5 = pnand %p608_p2, %p594_p3  ;;  %p616_p4 = scmp.lt.s32.totalorder %s614_s5, %s607_s29 }
  0x2c   : > { %p611_p11 = pneg %p610_p5  ;;  %p617_p7 = por %p616_p4, %p615_p9 }
  0x2e   : > { %p618_p10 = pnand %p617_p7, %p611_p11 }
  0x30   : > { %621 = shalt.err (!%p618_p10)
}
  0x31   : > { %s773_s7 = smov 256   ;;  %s774_s11 = smov 16  }
  0x32   : > { %526 = dma.hbm_to_vmem [thread:$0]  (!%p878_p0), %s872_s6, 512, %s874_s8, %s180_s10, %s773_s7, %s773_s7, %s774_s11  }
  0x33   : > { %p223_p12 = scmp.lt.s32.totalorder %s770_s17, 3  ;;  %s497_s18 = sshll.u32 %s865_s28, 4 }
  0x34   : > { %s513_s19 = sshll.u32 %s766_s16, 8  ;;  %p1059_p9 = scmp.ge.s32.totalorder %s770_s17, 1 }
  0x35   : > { %s923_s29 = scalar_lea.hbm %s1049_s1, %s513_s19  ;;  %s207_s30 = scalar_lea.vmem [#allocation5], %s497_s18 }
  0x36   : > { %p916_p11 = pnand %p1059_p9, %p223_p12  ;;  %s218_s4 = sshll.u32 %s207_s30, 4  ;;  %s219_s4 = int_to_ptr.vmem [resolvable:$true] %s218_s4 }
  0x37   : > { %s204_s6 = scalar_lea.sflag [#allocation6], %s865_s28  ;;  %s622_s8 = scalar_lea.hbm %s923_s29, 256 }
  0x38   : > { %s1060_s21 = scalar_select %p916_p11, 1, 0 }
  0x39   : > { %p623_p1 = scmp.ne.s32.totalorder %s923_s29, %s622_s8  ;;  %s627_s7 = scalar_lea.hbm %s1049_s1, 512 }
  0x3a   : > { %p628_p2 = scmp.lt.u32.totalorder %s923_s29, %s1049_s1  ;;  %p629_p5 = scmp.lt.u32.totalorder %s627_s7, %s622_s8 }
  0x3b   : > { %p625_p6 = pnand %p623_p1, %p594_p3  ;;  %p631_p7 = scmp.lt.u32.totalorder %s622_s8, %s923_s29 }
  0x3c   : > { %p630_p4 = por %p629_p5, %p628_p2 }
  0x3d   : > { %p626_p13 = pneg %p625_p6 }
  0x3e   : > { %p632_p10 = por %p631_p7, %p630_p4 }
  0x40   : > { %p633_p12 = pnand %p632_p10, %p626_p13 }
  0x42   : > { %636 = shalt.err (!%p633_p12)
}
  0x43   : > { %s637_s28 = scalar_lea.vmem %s219_s4, 256  ;;  %s775_s18 = smov [#allocation5]  }
  0x44   : > { %p638_p9 = scmp.ne.s32.totalorder %s219_s4, %s637_s28  ;;  %s642_s22 = sshll.u32 %s775_s18, 4  ;;  %s643_s22 = int_to_ptr.vmem [resolvable:$false] %s642_s22 }
  0x45   : > { %s644_s23 = scalar_lea.vmem %s643_s22, 512  ;;  %p645_p8 = scmp.lt.s32.totalorder %s219_s4, %s643_s22 }
  0x46   : > { %p640_p1 = pnand %p638_p9, %p594_p3  ;;  %p646_p11 = scmp.lt.s32.totalorder %s644_s23, %s637_s28 }
  0x48   : > { %p641_p6 = pneg %p640_p1  ;;  %p647_p2 = por %p646_p11, %p645_p8 }
  0x4a   : > { %p648_p5 = pnand %p647_p2, %p641_p6 }
  0x4c   : > { %651 = shalt.err (!%p648_p5)
}
  0x4d   : > { %529 = dma.hbm_to_vmem [thread:$0]  (!%p878_p0), %s923_s29, 256, %s219_s4, %s204_s6  }
  0x4e   : > { %p1061_p13 = scmp.ne.s32.totalorder %s1060_s21, 0 }
  0x4f   : > { %s948_s30 = sand.u32 (!%p1061_p13), 1, %s754_s13   ;;  %p1062_p3 = scmp.ne.s32.totalorder (!%p1061_p13), %s1055_s24, 0 }
  0x50   : > { %227 = sbr.rel (%p1061_p13) target bundleno = 143 (0x8f), region = 28  ;;  %s501_s8 = sshll.u32 (!%p1061_p13), %s948_s30, 5 }
  0x51   : > { %s230_s10 = scalar_lea.sflag (!%p1061_p13), [#allocation3], %s948_s30  ;;  %s233_s5 = scalar_lea.vmem (!%p1061_p13), [#allocation2], %s501_s8 }
  0x57   : > { %733 = dma.done.wait (%p1062_p3), %s230_s10, 512  }
  0x58   : > { %735 = vsyncadd (%p1062_p3), %s230_s10, 4294966784  ;;  %s502_s9 = sshll.u32 %s948_s30, 4  ;;  %s239_s21 = scalar_lea.sflag [#allocation6], %s948_s30 }
  0x59   : > { %s242_s29 = scalar_lea.vmem [#allocation5], %s502_s9 }
  0x5a   : > { %737 = dma.done.wait (%p1062_p3), %s239_s21, 256  }
  0x5b   : > { %739 = vsyncadd (%p1062_p3), %s239_s21, 4294967040  ;;  %s504_s4 = sshll.u32 %s948_s30, 3  ;;  %s514_s6 = sshll.u32 %s762_s15, 8  ;;  %v286_v0 = vld [vmem:[%s233_s5] sm:$0xff]  ;;  %v287_v1 = vld [vmem:[%s233_s5 + $0x8] sm:$0xff] }
  0x5c   : > { %v288_v2 = vld [vmem:[%s233_s5 + $0x10] sm:$0xff]  ;;  %s267_s7 = scalar_lea.vmem [#allocation7], %s502_s9  ;;  %v294_v3 = vadd.f32 %v287_v1, %v286_v0  ;;  %v289_v4 = vld [vmem:[%s233_s5 + $0x18] sm:$0xff]  ;;  %s967_s24 = scalar_lea.hbm %s1050_s2, %s514_s6 }
  0x5d   : > { %s325_s11 = sshll.u32 %s267_s7, 4  ;;  %v290_v5 = vld [vmem:[%s242_s29] sm:$0xff]  ;;  %v291_v6 = vld [vmem:[%s242_s29 + $0x8] sm:$0xff]  ;;  %v295_v7 = vadd.f32 %v289_v4, %v288_v2  ;;  %s509_s18 = sshll.u32 %s762_s15, 7  ;;  %s970_s11 = int_to_ptr.vmem [resolvable:$true] %s325_s11 }
  0x5e   : > { %v301_v8 = vadd.f32 %v291_v6, %v290_v5  ;;  %s274_s22 = scalar_lea.vmem [#allocation8], %s504_s4  ;;  %298 = vst [vmem:[%s267_s7] sm:$0xff] %v294_v3  ;;  %s975_s5 = scalar_lea.hbm %s1051_s3, %s509_s18 }
  0x5f   : > { %s342_s23 = sshll.u32 %s274_s22, 4  ;;  %299 = vst [vmem:[%s267_s7 + $0x8] sm:$0xff] %v295_v7  ;;  %s305_s9 = scalar_lea.sflag [#allocation4], %s948_s30  ;;  %s977_s23 = int_to_ptr.vmem [resolvable:$true] %s342_s23 }
  0x60   : > { %303 = vst [vmem:[%s274_s22] sm:$0xff] %v301_v8  ;;  %s652_s21 = scalar_lea.vmem %s970_s11, 256  ;;  %p1063_p0 = scmp.ne.s32.totalorder %s1056_s25, 0 }
  0x61   : > { %p653_p8 = scmp.ne.s32.totalorder %s970_s11, %s652_s21  ;;  %s776_s15 = smov [#allocation7]  }
  0x62   : > { %s656_s29 = sshll.u32 %s776_s15, 4  ;;  %s657_s29 = int_to_ptr.vmem [resolvable:$false] %s656_s29 }
  0x63   : > { %p654_p11 = pnand %p653_p8, %p1063_p0  ;;  %s658_s4 = scalar_lea.vmem %s657_s29, 512 }
  0x64   : > { %p659_p7 = scmp.lt.s32.totalorder %s970_s11, %s657_s29  ;;  %p660_p10 = scmp.lt.s32.totalorder %s658_s4, %s652_s21 }
  0x65   : > { %p655_p4 = pneg %p654_p11 }
  0x66   : > { %p661_p12 = por %p660_p10, %p659_p7 }
  0x68   : > { %p662_p9 = pnand %p661_p12, %p655_p4 }
  0x6a   : > { %665 = shalt.err (!%p662_p9)
}
  0x6b   : > { %s666_s6 = scalar_lea.hbm %s967_s24, 256  ;;  %s670_s28 = scalar_lea.hbm %s1050_s2, 512 }
  0x6c   : > { %p667_p1 = scmp.ne.s32.totalorder %s967_s24, %s666_s6  ;;  %p671_p5 = scmp.lt.u32.totalorder %s967_s24, %s1050_s2 }
  0x6d   : > { %p672_p13 = scmp.lt.u32.totalorder %s670_s28, %s666_s6  ;;  %p674_p8 = scmp.lt.u32.totalorder %s666_s6, %s967_s24 }
  0x6e   : > { %p668_p6 = pnand %p667_p1, %p1063_p0 }
  0x6f   : > { %p673_p3 = por %p672_p13, %p671_p5 }
  0x70   : > { %p669_p2 = pneg %p668_p6 }
  0x71   : > { %p675_p11 = por %p674_p8, %p673_p3 }
  0x73   : > { %p676_p4 = pnand %p675_p11, %p669_p2 }
  0x75   : > { %679 = shalt.err (!%p676_p4)
}
  0x76   : > { %s777_s8 = smov 128   ;;  %s778_s10 = smov 8  }
  0x77   : > { %519 = dma.vmem_to_hbm [thread:$0]  (%p1063_p0), %s970_s11, 256, %s967_s24, %s305_s9, %s777_s8, %s777_s8, %s778_s10  }
  0x78   : > { %s310_s21 = scalar_lea.sflag [#allocation9], %s948_s30  ;;  %s680_s15 = scalar_lea.vmem %s977_s23, 128 }
  0x79   : > { %p681_p7 = scmp.ne.s32.totalorder %s977_s23, %s680_s15  ;;  %s779_s29 = smov [#allocation8]  }
  0x7a   : > { %s684_s4 = sshll.u32 %s779_s29, 4  ;;  %s685_s4 = int_to_ptr.vmem [resolvable:$false] %s684_s4 }
  0x7b   : > { %p682_p10 = pnand %p681_p7, %p1063_p0  ;;  %s686_s6 = scalar_lea.vmem %s685_s4, 256 }
  0x7c   : > { %p687_p9 = scmp.lt.s32.totalorder %s977_s23, %s685_s4  ;;  %p688_p1 = scmp.lt.s32.totalorder %s686_s6, %s680_s15 }
  0x7d   : > { %p683_p12 = pneg %p682_p10 }
  0x7e   : > { %p689_p6 = por %p688_p1, %p687_p9 }
  0x80   : > { %p690_p2 = pnand %p689_p6, %p683_p12 }
  0x82   : > { %693 = shalt.err (!%p690_p2)
}
  0x83   : > { %s694_s30 = scalar_lea.hbm %s975_s5, 128  ;;  %s698_s9 = scalar_lea.hbm %s1051_s3, 256 }
  0x84   : > { %p695_p5 = scmp.ne.s32.totalorder %s975_s5, %s694_s30  ;;  %p699_p8 = scmp.lt.u32.totalorder %s975_s5, %s1051_s3 }
  0x85   : > { %p700_p11 = scmp.lt.u32.totalorder %s698_s9, %s694_s30  ;;  %p702_p7 = scmp.lt.u32.totalorder %s694_s30, %s975_s5 }
  0x86   : > { %p696_p13 = pnand %p695_p5, %p1063_p0 }
  0x87   : > { %p701_p4 = por %p700_p11, %p699_p8 }
  0x88   : > { %p697_p3 = pneg %p696_p13 }
  0x89   : > { %p703_p10 = por %p702_p7, %p701_p4 }
  0x8b   : > { %p704_p12 = pnand %p703_p10, %p697_p3 }
  0x8d   : > { %707 = shalt.err (!%p704_p12)
}
  0x8e   : > { %520 = dma.vmem_to_hbm [thread:$0]  (%p1063_p0), %s977_s23, 128, %s975_s5, %s310_s21  }
  0x8f PF: > { %s354_s28 = sand.u32 1, %s750_s12   ;;  %p1064_p9 = scmp.ne.s32.totalorder %s1057_s27, 0 }
  0x90   : > { %p1065_p1 = scmp.ge.s32.totalorder %s770_s17, 2  ;;  %s355_s18 = scalar_lea.sflag [#allocation4], %s354_s28 }
  0x92   : > { %p531_p6 = pnand %p1065_p1, %p1064_p9 }
  0x94   : > { %741 = dma.done.wait (!%p531_p6), %s355_s18, 256  }
  0x95   : > { %743 = vsyncadd (!%p531_p6), %s355_s18, 4294967040  ;;  %s364_s22 = scalar_lea.sflag [#allocation9], %s354_s28 }
  0x96   : > { %745 = dma.done.wait (!%p531_p6), %s364_s22, 128  }
  0x97   : > { %747 = vsyncadd (!%p531_p6), %s364_s22, 4294967168  ;;  %s26_s17 = sadd.s32 1, %s770_s17   ;;  %s1066_s12 = smov %s754_s13 }
  0x98   : > { %p23_p2 = scmp.ge.s32.totalorder %s26_s17, 4   ;;  %s1067_s13 = smov %s758_s14 }
  0x99   : > { %s1068_s14 = smov %s856_s26  ;;  %s1069_s15 = smov %s766_s16 }
  0x9a   : > { %s1070_s16 = smov %s1072_s20  ;;  %25 = sbr.rel (!%p23_p2) target bundleno = 10 (0xa), region = 107 }
  0xa1   :  { %369 = vsyncpa [#allocation3], 1 }
  0xa2   :  { %371 = vsyncpa [#allocation3 + $0x1], 1 }
  0xa3   :  { %372 = vsyncpa [#allocation6], 1 }
  0xa4   :  { %374 = vsyncpa [#allocation6 + $0x1], 1 }
  0xa5   :  { %375 = vsyncpa [#allocation4], 1 }
  0xa6   :  { %377 = vsyncpa [#allocation4 + $0x1], 1 }
  0xa7   :  { %378 = vsyncpa [#allocation9], 1 }
  0xa8   :  { %380 = vsyncpa [#allocation9 + $0x1], 1 }

</bundles_post_ra>
